<compile_context>
chip_gen: v7x
topology: tpu7x:2x2x1
jax: 0.10.0
libtpu: 0.0.40
codegen_flags: <defaults>
</compile_context>

<pallas_src>
import functools
import math

import jax
import jax.numpy as jnp
from jax.experimental import pallas as pl
from jax.experimental.pallas import tpu as pltpu


def _round_up(x, m):
    return ((x + m - 1) // m) * m


def _padded_bytes_2d(r, c, itemsize):
    """(8,128)-tiled VMEM footprint of an (r, c) buffer."""
    return _round_up(r, 8) * _round_up(c, 128) * itemsize


def _vmem_capacity_bytes():
    """Per-core VMEM capacity; conservative (v7x-sized) fallback if the query
    is unavailable."""
    try:
        cap = getattr(pltpu.get_tpu_info(), "vmem_capacity_bytes", None)
        if cap:
            return int(cap)
    except Exception:
        pass
    return 64 * 1024 * 1024


def _vmem_need(tb, dk, C, c_out, in_itemsize, out_itemsize):
    """(8,128)-padded VMEM footprint: double-buffered x/out tiles, W/b double
    buffers (Pallas allocates 2 even with constant index_maps), a possible f32
    product temp, and the f32 accumulator scratch."""
    c8 = _round_up(C, 8)
    dk_pad = _round_up(dk, 128)
    x_blk = tb * c8 * dk_pad * in_itemsize
    x_tmp = tb * c8 * dk_pad * 4                      # possible f32 product temp
    w_blk = c8 * dk_pad * in_itemsize
    b_blk = _padded_bytes_2d(1, C, in_itemsize)
    o_blk = _padded_bytes_2d(tb, c_out, out_itemsize)
    acc = _padded_bytes_2d(tb, c_out, 4)
    return 2 * x_blk + x_tmp + 2 * w_blk + 2 * b_blk + 2 * o_blk + acc


def _max_batch_tile(B, C, c_out, dk, in_itemsize, out_itemsize, budget):
    """Largest batch tile (multiple of 8, or the whole batch) whose padded
    working set fits `budget`; 0 if even the minimum tile does not fit."""
    c8 = _round_up(C, 8)
    dk_pad = _round_up(dk, 128)
    per_row = (c8 * dk_pad * (2 * in_itemsize + 4)
               + _round_up(c_out, 128) * (2 * out_itemsize + 4))
    fixed = (2 * c8 * dk_pad * in_itemsize
             + 2 * _padded_bytes_2d(1, C, in_itemsize))
    tb = (budget - fixed) // per_row
    if tb >= B:
        return B
    if tb < 8:
        return 0
    return int((tb // 8) * 8)


def _plan_tiles(B, C, D, in_itemsize, out_itemsize, c_out, vmem_cap, batch_tile):
    """Returns (batch_tile, d_chunk, d_work).  d_work == D unless the hidden
    dim had to be zero-padded to a multiple of 128 for the D-split path."""
    budget = max(int(vmem_cap * 0.55), 8 * 1024 * 1024)

    def fit(dk):
        return _max_batch_tile(B, C, c_out, dk, in_itemsize, out_itemsize, budget)

    # 1) Preferred: whole hidden dim in one block (pure streaming, no re-fetch
    #    of W per batch tile).
    tb = fit(D)
    if tb > 0:
        dk, d_work = D, D
    else:
        # 2) D-split fallback: chunk the hidden dim in multiples of 128 that
        #    divide it exactly (zero-pad D in the wrapper if needed, so partial
        #    blocks never read unspecified data).
        d_work = _round_up(D, 128)
        n128 = d_work // 128
        dk = 128
        for nchunks in range(2, n128 + 1):
            if n128 % nchunks:
                continue
            cand = d_work // nchunks
            if fit(cand) > 0:
                dk = cand
                break
        tb = fit(dk)
        if tb <= 0:
            tb = min(8, B)     # enormous num_class: minimum tile, limit raised below

    if batch_tile is not None:
        tb = min(int(batch_tile), B)
        if tb < B:
            tb = max((tb // 8) * 8, min(8, B))

    return tb, dk, d_work


def _gwl_kernel(x_ref, w_ref, b_ref, o_ref, acc_ref, *, num_class, out_class):
    # x_ref: (TB, C, dk)  w_ref: (C, dk)  b_ref: (1, c_out)
    # o_ref: (TB, c_out)  acc_ref: (TB, c_out) f32 scratch
    k = pl.program_id(1)

    @pl.when(k == 0)
    def _():
        acc_ref[...] = jnp.zeros_like(acc_ref)

    # f32 multiply (bf16-safe accumulate) + lane-axis reduce on the XLU.
    x = x_ref[...].astype(jnp.float32)
    w = w_ref[...].astype(jnp.float32)
    red = jnp.sum(x * w[None, :, :], axis=-1)          # (TB, C) f32
    if out_class > num_class:                           # static branch
        red = jnp.pad(red, ((0, 0), (0, out_class - num_class)))
    acc_ref[...] += red

    @pl.when(k == pl.num_programs(1) - 1)
    def _():
        o_ref[...] = (acc_ref[...] + b_ref[...].astype(jnp.float32)
                      ).astype(o_ref.dtype)


def groupwise_linear(x, W, b, *, batch_tile=None):
    """x: (B, C, D), W: (C, D), b: (1, C) -> (B, C).  out = (W * x).sum(-1) + b."""
    B, C, D = x.shape
    assert W.shape == (C, D) and b.shape == (1, C)

    out_dtype = x.dtype
    in_itemsize = jnp.dtype(x.dtype).itemsize
    out_itemsize = jnp.dtype(out_dtype).itemsize

    vmem_cap = _vmem_capacity_bytes()

    # Lane-dense (multiple-of-128) output stores only when the padded
    # writeback is negligible relative to the input traffic.
    c_pad = _round_up(C, 128)
    pad_out = (c_pad != C) and (C * D >= 16 * c_pad)
    c_out = c_pad if pad_out else C

    tb, dk, d_work = _plan_tiles(B, C, D, in_itemsize, out_itemsize, c_out,
                                 vmem_cap, batch_tile)

    x_in, w_in, b_in = x, W, b
    if d_work != D:
        # Zero padding contributes nothing to the reduction.
        x_in = jnp.pad(x, ((0, 0), (0, 0), (0, d_work - D)))
        w_in = jnp.pad(W, ((0, 0), (0, d_work - D)))
    if pad_out:
        b_in = jnp.pad(b, ((0, 0), (0, c_out - C)))

    nb = pl.cdiv(B, tb)
    nd = d_work // dk
    grid = (nb, nd)

    vmem_needed = _vmem_need(tb, dk, C, c_out, in_itemsize, out_itemsize)
    vmem_limit = max(int(1.3 * vmem_needed), 32 * 1024 * 1024)
    vmem_limit = min(vmem_limit, int(vmem_cap * 0.85))   # headroom on every gen
    vmem_limit = int(max(vmem_limit, 16 * 1024 * 1024))

    kernel = functools.partial(_gwl_kernel, num_class=C, out_class=c_out)

    out = pl.pallas_call(
        kernel,
        out_shape=jax.ShapeDtypeStruct((B, c_out), out_dtype),
        grid=grid,
        in_specs=[
            pl.BlockSpec((tb, C, dk), lambda i, k: (i, 0, k)),   # streamed x
            pl.BlockSpec((C, dk), lambda i, k: (0, k)),          # W chunk(s)
            pl.BlockSpec((1, c_out), lambda i, k: (0, 0)),       # resident b
        ],
        out_specs=pl.BlockSpec((tb, c_out), lambda i, k: (i, 0)),
        scratch_shapes=[pltpu.VMEM((tb, c_out), jnp.float32)],
        compiler_params=pltpu.CompilerParams(
            dimension_semantics=("parallel", "arbitrary"),
            vmem_limit_bytes=vmem_limit,
        ),
        cost_estimate=pl.CostEstimate(
            flops=2 * B * C * D,
            transcendentals=0,
            bytes_accessed=(in_itemsize * (B * C * D + C * D + C)
                            + out_itemsize * B * c_out),
        ),
    )(x_in, w_in, b_in)

    return out[:, :C] if pad_out else out


def init_params(key, num_class, hidden_dim, dtype=jnp.float32):
    # Deterministic re-implementation of reset_parameters():
    # uniform(-stdv, stdv) with stdv = 1/sqrt(hidden_dim).
    stdv = 1.0 / math.sqrt(hidden_dim)
    k_w, k_b = jax.random.split(key)
    W = jax.random.uniform(k_w, (num_class, hidden_dim), dtype,
                           minval=-stdv, maxval=stdv)
    b = jax.random.uniform(k_b, (1, num_class), dtype,
                           minval=-stdv, maxval=stdv)
    return W, b


if __name__ == "__main__":
    B, num_class, hidden_dim = 16, 8, 32

    key = jax.random.PRNGKey(0)
    k_x, k_p = jax.random.split(key)

    x = jax.random.normal(k_x, (B, num_class, hidden_dim), jnp.float32)
    W, b = init_params(k_p, num_class, hidden_dim)

    # Small batch tile so the test exercises a multi-step, pipelined grid.
    out = groupwise_linear(x, W, b, batch_tile=8)
    out = jax.block_until_ready(out)

    # Pure-JAX reference (same semantics as the PyTorch forward).
    ref = jnp.sum(W[None, :, :] * x, axis=-1) + b
    assert out.shape == (B, num_class)
    assert jnp.allclose(out, ref, atol=1e-5, rtol=1e-5)

    print("KERNEL_OK")
</pallas_src>

<mosaic_0001>
module attributes {stable_mosaic.version = 11 : i64} {
  func.func @_gwl_kernel(%arg0: i32, %arg1: i32, %arg2: memref<8x8x32xf32, #tpu.memory_space<vmem>>, %arg3: memref<8x32xf32, #tpu.memory_space<vmem>>, %arg4: memref<1x8xf32, #tpu.memory_space<vmem>>, %arg5: memref<8x8xf32, #tpu.memory_space<vmem>>, %arg6: memref<8x8xf32, #tpu.memory_space<vmem>>) attributes {dimension_semantics = [#tpu.dimension_semantics<parallel>, #tpu.dimension_semantics<arbitrary>], iteration_bounds = array<i64: 2, 1>, scalar_prefetch = 0 : i64, scratch_operands = 1 : i64, tpu.core_type = #tpu.core_type<tc>, window_params = [{transform_indices = @transform_0, window_bounds = array<i64: 8, 8, 32>}, {transform_indices = @transform_1, window_bounds = array<i64: 8, 32>}, {pipeline_mode = #tpu.pipeline_mode<synchronous>, transform_indices = @transform_2, window_bounds = array<i64: 1, 8>}, {transform_indices = @transform_3, window_bounds = array<i64: 8, 8>}]} {
    %c0_i32 = arith.constant 0 : i32
    %0 = arith.cmpi eq, %arg1, %c0_i32 : i32
    %1 = arith.extui %0 : i1 to i32
    %c0_i32_0 = arith.constant 0 : i32
    %2 = arith.cmpi ne, %1, %c0_i32_0 : i32
    scf.if %2 {
      %cst_11 = arith.constant 0.000000e+00 : f32
      %15 = vector.broadcast %cst_11 : f32 to vector<8x8xf32>
      %c0_12 = arith.constant 0 : index
      %c0_13 = arith.constant 0 : index
      %16 = vector.load %arg6[%c0_12, %c0_13] : memref<8x8xf32, #tpu.memory_space<vmem>>, vector<8x8xf32>
      tpu.vector_store %arg6[%c0_12, %c0_13], %15 {strides = array<i32>} : memref<8x8xf32, #tpu.memory_space<vmem>>, vector<8x8xf32>,
    } else {
    }
    %c0 = arith.constant 0 : index
    %c0_1 = arith.constant 0 : index
    %c0_2 = arith.constant 0 : index
    %3 = vector.load %arg2[%c0, %c0_1, %c0_2] : memref<8x8x32xf32, #tpu.memory_space<vmem>>, vector<8x8x32xf32>
    %c0_3 = arith.constant 0 : index
    %c0_4 = arith.constant 0 : index
    %4 = vector.load %arg3[%c0_3, %c0_4] : memref<8x32xf32, #tpu.memory_space<vmem>>, vector<8x32xf32>
    %5 = vector.shape_cast %4 : vector<8x32xf32> to vector<1x8x32xf32>
    %6 = vector.broadcast %5 : vector<1x8x32xf32> to vector<8x8x32xf32>
    %7 = arith.mulf %3, %6 : vector<8x8x32xf32>
    %cst = arith.constant dense<0.000000e+00> : vector<8x8xf32>
    %8 = vector.multi_reduction <add>, %7, %cst [2] : vector<8x8x32xf32> to vector<8x8xf32>
    %c0_5 = arith.constant 0 : index
    %c0_6 = arith.constant 0 : index
    %9 = vector.load %arg6[%c0_5, %c0_6] : memref<8x8xf32, #tpu.memory_space<vmem>>, vector<8x8xf32>
    %10 = arith.addf %9, %8 : vector<8x8xf32>
    %c0_7 = arith.constant 0 : index
    %c0_8 = arith.constant 0 : index
    %11 = vector.load %arg6[%c0_7, %c0_8] : memref<8x8xf32, #tpu.memory_space<vmem>>, vector<8x8xf32>
    tpu.vector_store %arg6[%c0_7, %c0_8], %10 {strides = array<i32>} : memref<8x8xf32, #tpu.memory_space<vmem>>, vector<8x8xf32>,
    %c0_i32_9 = arith.constant 0 : i32
    %12 = arith.cmpi eq, %arg1, %c0_i32_9 : i32
    %13 = arith.extui %12 : i1 to i32
    %c0_i32_10 = arith.constant 0 : i32
    %14 = arith.cmpi ne, %13, %c0_i32_10 : i32
    scf.if %14 {
      %c0_11 = arith.constant 0 : index
      %c0_12 = arith.constant 0 : index
      %15 = vector.load %arg6[%c0_11, %c0_12] : memref<8x8xf32, #tpu.memory_space<vmem>>, vector<8x8xf32>
      %c0_13 = arith.constant 0 : index
      %c0_14 = arith.constant 0 : index
      %16 = vector.load %arg4[%c0_13, %c0_14] : memref<1x8xf32, #tpu.memory_space<vmem>>, vector<1x8xf32>
      %17 = vector.broadcast %16 : vector<1x8xf32> to vector<8x8xf32>
      %18 = arith.addf %15, %17 : vector<8x8xf32>
      %c0_15 = arith.constant 0 : index
      %c0_16 = arith.constant 0 : index
      %19 = vector.load %arg5[%c0_15, %c0_16] : memref<8x8xf32, #tpu.memory_space<vmem>>, vector<8x8xf32>
      tpu.vector_store %arg5[%c0_15, %c0_16], %18 {strides = array<i32>} : memref<8x8xf32, #tpu.memory_space<vmem>>, vector<8x8xf32>,
    } else {
    }
    return
  }
  func.func @transform_0(%arg0: i32, %arg1: i32) -> (i32, i32, i32) {
    %c0_i32 = arith.constant 0 : i32
    %c0_i32_0 = arith.constant 0 : i32
    return %arg0, %c0_i32, %arg1 : i32, i32, i32
  }
  func.func @transform_1(%arg0: i32, %arg1: i32) -> (i32, i32) {
    %c0_i32 = arith.constant 0 : i32
    %c0_i32_0 = arith.constant 0 : i32
    return %c0_i32, %arg1 : i32, i32
  }
  func.func @transform_2(%arg0: i32, %arg1: i32) -> (i32, i32) {
    %c0_i32 = arith.constant 0 : i32
    %c0_i32_0 = arith.constant 0 : i32
    %c0_i32_1 = arith.constant 0 : i32
    return %c0_i32, %c0_i32_0 : i32, i32
  }
  func.func @transform_3(%arg0: i32, %arg1: i32) -> (i32, i32) {
    %c0_i32 = arith.constant 0 : i32
    %c0_i32_0 = arith.constant 0 : i32
    return %arg0, %c0_i32 : i32, i32
  }
}

</mosaic_0001>

<bundles_post_ra>
// kernel: tpu_custom_call.1
= control target key start
LH: loop header
LB: loop body
LE: loop exit
PB: predicated region body
PF: predicated region fallthrough
CT: control target
= control target key end

     0   :  { %8 = vsyncpa [#allocation4], 0  ;;  %s842_s0 = inlined_call_operand.hbm [shape: f32[16,8,32], index: 0, kind: input, shape index: {}]   ;;  %s843_s1 = inlined_call_operand.hbm [shape: f32[8,32], index: 1, kind: input, shape index: {}]   ;;  %s844_s2 = inlined_call_operand.vmem [shape: f32[1,8], index: 2, kind: input, shape index: {}]   ;;  %s845_s3 = inlined_call_operand.vmem [shape: f32[16,8], index: 3, kind: output, shape index: {}]  }
   0x1   :  { %10 = vsyncpa [#allocation4 + $0x1], 0 }
   0x2   :  { %11 = vsyncpa [#allocation6], 0  ;;  %s658_s12 = smov 0   ;;  %s660_s13 = smov 0  }
   0x3   :  { %s662_s14 = smov 0   ;;  %s664_s15 = smov 0  }
   0x4   :  { %s666_s16 = smov 0   ;;  %s668_s17 = smov 0  }
   0x5 LB: > { %s434_s18 = sadd.s32 4294967295, %s631_s17   ;;  %s38_s19 = sadd.s32 1, %s619_s14  ;;  %s631_s17 = sphi %s668_s17, %s17_s17   ;;  %s627_s16 = sphi %s666_s16, %s865_s16   ;;  %s623_s15 = sphi %s664_s15, %s864_s15   ;;  %s619_s14 = sphi %s662_s14, %s863_s14   ;;  %s615_s13 = sphi %s660_s13, %s862_s13   ;;  %s611_s12 = sphi %s658_s12, %s861_s12  }
   0x6   : > { %p45_p0 = scmp.ne.s32.totalorder %s619_s14, %s615_s13  ;;  %p46_p1 = scmp.eq.s32.totalorder %s631_s17, 0 }
   0x7   : > { %p51_p2 = scmp.ne.s32.totalorder %s615_s13, %s611_s12  ;;  %p692_p3 = scmp.eq.s32.totalorder %s434_s18, 0 }
   0x8   : > { %p47_p4 = por %p46_p1, %p45_p0  ;;  %p436_p5 = scmp.ge.s32.totalorder %s631_s17, 1 }
   0x9   : > { %s851_s20 = scalar_select %p692_p3, 1, 0 }
   0xa   : > { %p699_p6 = por %p692_p3, %p51_p2  ;;  %p135_p7 = scmp.lt.s32.totalorder %s631_s17, 3 }
   0xb   : > { %s633_s23 = smov [#allocation5]   ;;  %p465_p10 = scmp.lt.s32.totalorder %s631_s17, 2 }
   0xc   : > { %s852_s21 = scalar_select %p699_p6, 1, 0 }
   0xd   : > { %p704_p8 = pnand %p436_p5, %p135_p7  ;;  %s150_s24 = sshll.u32 %s633_s23, 4  ;;  %s151_s24 = int_to_ptr.vmem [resolvable:$true] %s150_s24 }
   0xe   : > { %s164_s25 = sand.u32 1, %s619_s14   ;;  %p718_p12 = pnand %p465_p10, %p47_p4 }
   0xf   : > { %s853_s22 = scalar_select %p704_p8, 1, 0 }
  0x10   : > { %p456_p9 = pneg %p704_p8  ;;  %s519_s30 = scalar_lea.hbm %s843_s1, 128 }
  0x11   : > { %s855_s27 = scalar_select %p718_p12, 1, 0 }
  0x12   : > { %p714_p11 = pnand %p456_p9, %p692_p3  ;;  %p520_p13 = scmp.ne.s32.totalorder %s843_s1, %s519_s30 }
  0x13   : > { %p526_p5 = scmp.lt.u32.totalorder %s519_s30, %s843_s1 }
  0x14   : > { %p521_p0 = pneg %p714_p11 }
  0x16   : > { %p522_p1 = pnand %p521_p0, %p520_p13 }
  0x18   : > { %p523_p2 = pneg %p522_p1 }
  0x1a   : > { %p528_p4 = pnand %p526_p5, %p523_p2 }
  0x1c   : > { %531 = shalt.err (!%p528_p4)
}
  0x1d   : > { %s532_s8 = scalar_lea.vmem %s151_s24, 128  ;;  %p540_p3 = scmp.lt.s32.totalorder %s151_s24, %s151_s24 }
  0x1e   : > { %p533_p7 = scmp.ne.s32.totalorder %s151_s24, %s532_s8  ;;  %p541_p6 = scmp.lt.s32.totalorder %s532_s8, %s532_s8 }
  0x20   : > { %p535_p9 = pnand %p533_p7, %p521_p0  ;;  %p542_p8 = por %p541_p6, %p540_p3 }
  0x22   : > { %p536_p10 = pneg %p535_p9 }
  0x24   : > { %p543_p12 = pnand %p542_p8, %p536_p10 }
  0x26   : > { %546 = shalt.err (!%p543_p12)
}
  0x27   : > { %459 = dma.hbm_to_vmem [thread:$0]  (!%p714_p11), %s843_s1, 128, %s151_s24, [#allocation6]  }
  0x28   : > { %s29_s11 = sadd.s32 1, %s627_s16  ;;  %s439_s12 = sshll.u32 %s164_s25, 6 }
  0x29   : > { %p31_p13 = scmp.ge.s32.totalorder %s29_s11, 2  ;;  %s449_s18 = sshll.u32 %s627_s16, 10 }
  0x2a   : > { %s168_s23 = scalar_lea.vmem [#allocation3], %s439_s12  ;;  %s747_s30 = scalar_lea.hbm %s842_s0, %s449_s18 }
  0x2b   : > { %s176_s28 = sshll.u32 %s168_s23, 4  ;;  %s867_s11 = smov (%p31_p13, %s29_s11), 0  ;;  %s749_s28 = int_to_ptr.vmem [resolvable:$true] %s176_s28 }
  0x2c   : > { %s33_s24 = ssub.s32 %s627_s16, %s867_s11  ;;  %s759_s5 = scalar_lea.sflag [#allocation4], %s164_s25 }
  0x2d   : > { %p753_p3 = scmp.eq.s32.totalorder %s33_s24, 0  ;;  %s547_s6 = scalar_lea.hbm %s747_s30, 1024 }
  0x2e   : > { %p548_p6 = scmp.ne.s32.totalorder %s747_s30, %s547_s6  ;;  %p857_p8 = scmp.ne.s32.totalorder %s855_s27, 0 }
  0x2f   : > { %s552_s9 = scalar_lea.hbm %s842_s0, 2048  ;;  %p553_p1 = scmp.lt.u32.totalorder %s747_s30, %s842_s0 }
  0x30   : > { %p549_p11 = pneg %p857_p8  ;;  %p554_p2 = scmp.lt.u32.totalorder %s552_s9, %s547_s6 }
  0x31   : > { %p556_p4 = scmp.lt.u32.totalorder %s547_s6, %s747_s30 }
  0x32   : > { %p550_p12 = pnand %p549_p11, %p548_p6  ;;  %p555_p5 = por %p554_p2, %p553_p1 }
  0x34   : > { %p551_p0 = pneg %p550_p12  ;;  %p557_p7 = por %p556_p4, %p555_p5 }
  0x36   : > { %p558_p9 = pnand %p557_p7, %p551_p0 }
  0x38   : > { %561 = shalt.err (!%p558_p9)
}
  0x39   : > { %s562_s25 = scalar_lea.vmem %s749_s28, 1024  ;;  %s634_s18 = smov [#allocation3]  }
  0x3a   : > { %p563_p10 = scmp.ne.s32.totalorder %s749_s28, %s562_s25  ;;  %s567_s23 = sshll.u32 %s634_s18, 4  ;;  %s568_s23 = int_to_ptr.vmem [resolvable:$false] %s567_s23 }
  0x3b   : > { %s569_s26 = scalar_lea.vmem %s568_s23, 2048  ;;  %p570_p12 = scmp.lt.s32.totalorder %s749_s28, %s568_s23 }
  0x3c   : > { %p565_p13 = pnand %p563_p10, %p549_p11  ;;  %p571_p1 = scmp.lt.s32.totalorder %s569_s26, %s562_s25 }
  0x3e   : > { %p566_p6 = pneg %p565_p13  ;;  %p572_p2 = por %p571_p1, %p570_p12 }
  0x40   : > { %p573_p5 = pnand %p572_p2, %p566_p6 }
  0x42   : > { %576 = shalt.err (!%p573_p5)
}
  0x43   : > { %s635_s29 = smov 128   ;;  %s636_s24 = smov 8  }
  0x44   : > { %463 = dma.hbm_to_vmem [thread:$0]  (!%p857_p8), %s747_s30, 1024, %s749_s28, %s759_s5, %s635_s29, %s635_s29, %s636_s24  }
  0x45   : > { %s792_s6 = scalar_select %p753_p3, %s619_s14, %s38_s19  }
  0x46   : > { %p858_p11 = scmp.ne.s32.totalorder %s853_s22, 0 }
  0x47   : > { %s190_s7 = sand.u32 (!%p858_p11), 1, %s615_s13   ;;  %p859_p0 = scmp.ne.s32.totalorder (!%p858_p11), %s852_s21, 0 }
  0x48   : > { %188 = sbr.rel (%p858_p11) target bundleno = 259 (0x103), region = 32  ;;  %s443_s8 = sshll.u32 (!%p858_p11), %s190_s7, 6 }
  0x49   : > { %s191_s9 = scalar_lea.sflag (!%p858_p11), [#allocation4], %s190_s7  ;;  %s194_s10 = scalar_lea.vmem (!%p858_p11), [#allocation3], %s443_s8 }
  0x4f   : > { %602 = dma.done.wait (%p859_p0), %s191_s9, 1024  }
  0x50   : > { %604 = vsyncadd (%p859_p0), %s191_s9, 4294966272  ;;  %p860_p8 = scmp.ne.s32.totalorder %s851_s20, 0 }
  0x52   : > { %606 = dma.done.wait (%p860_p8), [#allocation6], 128  }
  0x53   : > { %608 = vsyncadd (%p860_p8), [#allocation6], 4294967168  ;;  %v231_v0 = vld [vmem:[%s194_s10] sm:$0xff]  ;;  %vm248_vm0 = vcmask 261120   ;;  %v233_v2 = vld [vmem:[%s194_s10 + $0x10] sm:$0xff]  ;;  %vm229_vm1 = vcmask 64512   ;;  %v282_v26 = vlaneseq }
  0x54   : > { %v239_v1 = vld [vmem:[#allocation5] sm:$0xff]  ;;  %v232_v5 = vld [vmem:[%s194_s10 + $0x8] sm:$0xff]  ;;  %v234_v6 = vld [vmem:[%s194_s10 + $0x18] sm:$0xff]  ;;  %v637_v25 = vmov 0.0   ;;  %vm316_vm2 = vcmask 1041409   ;;  %vm318_vm3 = vcmask 1042434  }
  0x55   : > { %v240_v3 = vmul.f32 %v239_v1, %v231_v0  ;;  %v242_v4 = vmul.f32 %v239_v1, %v233_v2  ;;  %v241_v7 = vmul.f32 %v239_v1, %v232_v5  ;;  %v243_v8 = vmul.f32 %v239_v1, %v234_v6  ;;  %v235_v9 = vld [vmem:[%s194_s10 + $0x20] sm:$0xff]  ;;  %v236_v10 = vld [vmem:[%s194_s10 + $0x28] sm:$0xff]  ;;  %v237_v17 = vld [vmem:[%s194_s10 + $0x30] sm:$0xff]  ;;  %230 = vst.msk [vmem:[#allocation2] sm:$0xff] %vm229_vm1, %v637_v25  ;;  %p221_p3 = scmp.lt.s32.totalorder %s623_s15, 1 }
  0x56   : > { %v244_v15 = vmul.f32 %v239_v1, %v235_v9  ;;  %v245_v16 = vmul.f32 %v239_v1, %v236_v10  ;;  %v238_v18 = vld [vmem:[%s194_s10 + $0x38] sm:$0xff]  ;;  %v246_v21 = vmul.f32 %v239_v1, %v237_v17  ;;  %v283_v27 = vand.u32 127, %v282_v26 }
  0x57   : > { %v249_v11 = vsel %vm248_vm0, %v240_v3, 0.0  ;;  %v255_v12 = vsel %vm248_vm0, %v242_v4, 0.0  ;;  %v252_v13 = vsel %vm248_vm0, %v241_v7, 0.0  ;;  %v258_v14 = vsel %vm248_vm0, %v243_v8, 0.0  ;;  %s869_s15 = smov (!%p221_p3, %s623_s15), 1 }
  0x58   : > { %250 = vadd.xlane.f32.xlu0 %v249_v11  ;;  %256 = vadd.xlane.f32.xlu1 %v255_v12  ;;  %v261_v19 = vsel %vm248_vm0, %v244_v15, 0.0  ;;  %v264_v20 = vsel %vm248_vm0, %v245_v16, 0.0  ;;  %v247_v22 = vmul.f32 %v239_v1, %v238_v18  ;;  %v267_v23 = vsel %vm248_vm0, %v246_v21, 0.0  ;;  %s445_s19 = sshll.u32 %s869_s15, 3  ;;  %v446_v55 = vld [vmem:[%s844_s2] ss:$0 sm:$0xff] }
  0x59   : > { %v285_v28 = vshrl.u32 %v282_v26, 7  ;;  %vm320_vm4 = vcmask 1043459   ;;  %vm322_vm5 = vcmask 1044484   ;;  %vm324_vm6 = vcmask 1045509   ;;  %s224_s28 = scalar_lea.vmem %s845_s3, %s445_s19 }
  0x5a   : > { %v270_v24 = vsel %vm248_vm0, %v247_v22, 0.0  ;;  %vm326_vm7 = vcmask 1046534   ;;  %vm328_vm8 = vcmask 1047559  }
  0x5b   : > { %v286_v31 = vsub.s32 %v283_v27, %v285_v28 }
  0x5c   : > { %253 = vadd.xlane.f32.xlu0 %v252_v13  ;;  %259 = vadd.xlane.f32.xlu1 %v258_v14  ;;  %v273_v51 = vld [vmem:[#allocation2] sm:$0xff] }
  0x60   : > { %262 = vadd.xlane.f32.xlu0 %v261_v19  ;;  %265 = vadd.xlane.f32.xlu1 %v264_v20 }
  0x64   : > { %268 = vadd.xlane.f32.xlu0 %v267_v23  ;;  %271 = vadd.xlane.f32.xlu1 %v270_v24 }
  0xe5   : > { %v251_v29 = vpop.xlane.xlu0 %250  ;;  %v257_v30 = vpop.xlane.xlu1 %256 }
  0xe6   : > { %v287_v34 = vrot.slane %v251_v29, %v286_v31  ;;  %v295_v37 = vrot.slane %v257_v30, %v286_v31 }
  0xe9   : > { %v254_v32 = vpop.xlane.xlu0 %253  ;;  %v260_v33 = vpop.xlane.xlu1 %259 }
  0xea   : > { %v291_v35 = vrot.slane %v254_v32, %v286_v31  ;;  %v299_v36 = vrot.slane %v260_v33, %v286_v31 }
  0xec   : > { %v317_v38 = vsel %vm316_vm2, %v291_v35, %v287_v34 }
  0xed   : > { %v319_v39 = vsel %vm318_vm3, %v295_v37, %v317_v38  ;;  %v263_v40 = vpop.xlane.xlu0 %262  ;;  %v266_v41 = vpop.xlane.xlu1 %265 }
  0xee   : > { %v321_v42 = vsel %vm320_vm4, %v299_v36, %v319_v39  ;;  %v303_v43 = vrot.slane %v263_v40, %v286_v31  ;;  %v307_v44 = vrot.slane %v266_v41, %v286_v31 }
  0xf0   : > { %v323_v45 = vsel %vm322_vm5, %v303_v43, %v321_v42 }
  0xf1   : > { %v269_v46 = vpop.xlane.xlu0 %268  ;;  %v272_v47 = vpop.xlane.xlu1 %271  ;;  %v325_v50 = vsel %vm324_vm6, %v307_v44, %v323_v45 }
  0xf2   : > { %v311_v48 = vrot.slane %v269_v46, %v286_v31  ;;  %v315_v49 = vrot.slane %v272_v47, %v286_v31 }
  0xf4   : > { %v327_v52 = vsel %vm326_vm7, %v311_v48, %v325_v50 }
  0xf5   : > { %v329_v53 = vsel %vm328_vm8, %v315_v49, %v327_v52 }
  0xf6   : > { %v331_v54 = vadd.f32 %v329_v53, %v273_v51 }
  0xf8   : > { %333 = vst.msk [vmem:[#allocation2] sm:$0xff] %vm229_vm1, %v331_v54 }
  0xff   : > { %v337_v56 = vld [vmem:[#allocation2] sm:$0xff] }
 0x100   : > { %v345_v57 = vadd.f32 %v446_v55, %v337_v56 }
 0x102   : > { %346 = vst.msk [vmem:[%s224_s28] sm:$0xff] %vm229_vm1, %v345_v57 }
 0x103 PF: > { %s17_s17 = sadd.s32 1, %s631_s17   ;;  %s861_s12 = smov %s615_s13 }
 0x104   : > { %p14_p4 = scmp.ge.s32.totalorder %s17_s17, 4   ;;  %s862_s13 = smov %s619_s14 }
 0x105   : > { %s863_s14 = smov %s792_s6  ;;  %s864_s15 = smov %s627_s16 }
 0x106   : > { %s865_s16 = smov %s867_s11  ;;  %16 = sbr.rel (!%p14_p4) target bundleno = 5 (0x5), region = 85 }
 0x10d   :  { %366 = vsyncpa [#allocation4], 1 }
 0x10e   :  { %368 = vsyncpa [#allocation4 + $0x1], 1 }
 0x10f   :  { %369 = vsyncpa [#allocation6], 1 }

</bundles_post_ra>
